<compile_context>
chip_gen: v5e
topology: v5e:2x2
jax: 0.10.0
libtpu: 0.0.40
codegen_flags: <defaults>
</compile_context>

<pallas_src>
import functools

import jax
import jax.numpy as jnp
from jax.experimental import pallas as pl
from jax.experimental.pallas import tpu as pltpu

HIDDEN_LAYERS = 2
HIDDEN_SIZE = 256
LANE = 128


def _actor_kernel(x_ref, w1_ref, b1_ref, w2_ref, b2_ref, w3_ref, b3_ref,
                  o_ref, *, max_action):
    # Layer 1: Linear + ReLU (bf16 MXU matmul, f32 accumulate)
    x = x_ref[...].astype(jnp.bfloat16)
    h = jnp.dot(x, w1_ref[...], preferred_element_type=jnp.float32)
    h = jnp.maximum(h + b1_ref[...], 0.0)
    # Layer 2: Linear + ReLU
    h = jnp.dot(h.astype(jnp.bfloat16), w2_ref[...],
                preferred_element_type=jnp.float32)
    h = jnp.maximum(h + b2_ref[...], 0.0)
    # Output layer: Linear + Tanh, scaled by max_action (lane-padded to 128)
    y = jnp.dot(h.astype(jnp.bfloat16), w3_ref[...],
                preferred_element_type=jnp.float32)
    y = y + b3_ref[...]
    o_ref[...] = (max_action * jnp.tanh(y)).astype(o_ref.dtype)


def actor_forward(x, params, max_action, action_dim, *, tile_m=256):
    """Fused Actor forward on TPU via one pallas_call.

    x: (B, state_dim) float32
    params: dict with w1 (S,H) bf16, b1 (1,H) f32, w2 (H,H) bf16, b2 (1,H) f32,
            w3 (H,A_pad) bf16, b3 (1,A_pad) f32   (A_pad = action_dim padded to 128)
    Returns (B, action_dim) float32.
    """
    B, S = x.shape
    A_pad = params["w3"].shape[1]

    # Pad batch to a multiple of 8 (sublane), then to a multiple of the tile.
    B_pad = -(-B // 8) * 8
    TM = min(int(tile_m), B_pad)
    TM = max(8, (TM // 8) * 8)
    B_pad = -(-B_pad // TM) * TM
    if B_pad != B:
        x = jnp.pad(x, ((0, B_pad - B), (0, 0)))

    grid = (B_pad // TM,)

    const = lambda shape: pl.BlockSpec(shape, lambda i: (0, 0))
    kernel = functools.partial(_actor_kernel, max_action=float(max_action))

    out = pl.pallas_call(
        kernel,
        out_shape=jax.ShapeDtypeStruct((B_pad, A_pad), jnp.float32),
        grid=grid,
        in_specs=[
            pl.BlockSpec((TM, S), lambda i: (i, 0)),      # x: tiled over batch
            const(params["w1"].shape),                     # weights: VMEM-resident
            const(params["b1"].shape),
            const(params["w2"].shape),
            const(params["b2"].shape),
            const(params["w3"].shape),
            const(params["b3"].shape),
        ],
        out_specs=pl.BlockSpec((TM, A_pad), lambda i: (i, 0)),
        compiler_params=pltpu.CompilerParams(
            dimension_semantics=("parallel",)),
    )(x, params["w1"], params["b1"], params["w2"], params["b2"],
      params["w3"], params["b3"])

    return out[:B, :action_dim]


def init_actor_params(key, state_dim, action_dim, hidden=HIDDEN_SIZE):
    """Deterministic init mirroring nn.Linear default (uniform +/- 1/sqrt(fan_in)).

    Weights are stored (in_dim, out_dim) bf16; biases stay f32 (tiny, added to
    the f32 accumulator). The output layer is zero-padded to 128 lanes.
    """
    a_pad = -(-action_dim // LANE) * LANE

    def linear(k, fan_in, fan_out, out_pad=None):
        kw, kb = jax.random.split(k)
        bound = 1.0 / jnp.sqrt(fan_in)
        w = jax.random.uniform(kw, (fan_in, fan_out), jnp.float32,
                               minval=-bound, maxval=bound)
        b = jax.random.uniform(kb, (1, fan_out), jnp.float32,
                               minval=-bound, maxval=bound)
        if out_pad is not None and out_pad != fan_out:
            w = jnp.pad(w, ((0, 0), (0, out_pad - fan_out)))
            b = jnp.pad(b, ((0, 0), (0, out_pad - fan_out)))
        return w.astype(jnp.bfloat16), b

    k1, k2, k3 = jax.random.split(key, 3)
    w1, b1 = linear(k1, state_dim, hidden)
    w2, b2 = linear(k2, hidden, hidden)
    w3, b3 = linear(k3, hidden, action_dim, out_pad=a_pad)
    return {"w1": w1, "b1": b1, "w2": w2, "b2": b2, "w3": w3, "b3": b3}


def actor_reference(x, params, max_action, action_dim):
    """Pure-JAX reference using the same bf16 weights / f32 accumulation."""
    h = jnp.dot(x.astype(jnp.bfloat16), params["w1"],
                preferred_element_type=jnp.float32) + params["b1"]
    h = jnp.maximum(h, 0.0)
    h = jnp.dot(h.astype(jnp.bfloat16), params["w2"],
                preferred_element_type=jnp.float32) + params["b2"]
    h = jnp.maximum(h, 0.0)
    y = jnp.dot(h.astype(jnp.bfloat16), params["w3"],
                preferred_element_type=jnp.float32) + params["b3"]
    return (max_action * jnp.tanh(y))[:, :action_dim]


if __name__ == "__main__":
    key = jax.random.PRNGKey(0)
    k_param, k_x = jax.random.split(key)

    STATE_DIM = 32     # small synthetic Ant-like observation dim
    ACTION_DIM = 8     # Ant action dim
    BATCH = 20         # not a multiple of the tile -> exercises padding + grid
    MAX_ACTION = 1.0

    params = init_actor_params(k_param, STATE_DIM, ACTION_DIM)
    x = jax.random.normal(k_x, (BATCH, STATE_DIM), jnp.float32)

    # tile_m=16 so the batch grid has >1 step even at this tiny test size;
    # production rollouts should use the default tile_m=256 with B >= 256.
    out = actor_forward(x, params, MAX_ACTION, ACTION_DIM, tile_m=16)
    out = jax.block_until_ready(out)

    ref = actor_reference(x, params, MAX_ACTION, ACTION_DIM)
    assert out.shape == (BATCH, ACTION_DIM)
    assert jnp.allclose(out, ref, atol=1e-2, rtol=1e-2), "mismatch vs reference"

    print("KERNEL_OK")
</pallas_src>

<mosaic_0001>
module attributes {stable_mosaic.version = 11 : i64} {
  func.func @_actor_kernel(%arg0: i32, %arg1: memref<16x32xf32, #tpu.memory_space<vmem>>, %arg2: memref<32x256xbf16, #tpu.memory_space<vmem>>, %arg3: memref<1x256xf32, #tpu.memory_space<vmem>>, %arg4: memref<256x256xbf16, #tpu.memory_space<vmem>>, %arg5: memref<1x256xf32, #tpu.memory_space<vmem>>, %arg6: memref<256x128xbf16, #tpu.memory_space<vmem>>, %arg7: memref<1x128xf32, #tpu.memory_space<vmem>>, %arg8: memref<16x128xf32, #tpu.memory_space<vmem>>) attributes {dimension_semantics = [#tpu.dimension_semantics<parallel>], iteration_bounds = array<i64: 2>, scalar_prefetch = 0 : i64, scratch_operands = 0 : i64, tpu.core_type = #tpu.core_type<tc>, window_params = [{transform_indices = @transform_0, window_bounds = array<i64: 16, 32>}, {pipeline_mode = #tpu.pipeline_mode<synchronous>, transform_indices = @transform_1, window_bounds = array<i64: 32, 256>}, {pipeline_mode = #tpu.pipeline_mode<synchronous>, transform_indices = @transform_2, window_bounds = array<i64: 1, 256>}, {pipeline_mode = #tpu.pipeline_mode<synchronous>, transform_indices = @transform_3, window_bounds = array<i64: 256, 256>}, {pipeline_mode = #tpu.pipeline_mode<synchronous>, transform_indices = @transform_4, window_bounds = array<i64: 1, 256>}, {pipeline_mode = #tpu.pipeline_mode<synchronous>, transform_indices = @transform_5, window_bounds = array<i64: 256, 128>}, {pipeline_mode = #tpu.pipeline_mode<synchronous>, transform_indices = @transform_6, window_bounds = array<i64: 1, 128>}, {transform_indices = @transform_7, window_bounds = array<i64: 16, 128>}]} {
    %c0 = arith.constant 0 : index
    %c0_0 = arith.constant 0 : index
    %0 = vector.load %arg1[%c0, %c0_0] : memref<16x32xf32, #tpu.memory_space<vmem>>, vector<16x32xf32>
    %1 = arith.truncf %0 : vector<16x32xf32> to vector<16x32xbf16>
    %c0_1 = arith.constant 0 : index
    %c0_2 = arith.constant 0 : index
    %2 = vector.load %arg2[%c0_1, %c0_2] : memref<32x256xbf16, #tpu.memory_space<vmem>>, vector<32x256xbf16>
    %cst = arith.constant dense<0.000000e+00> : vector<16x256xf32>
    %3 = tpu.matmul %1, %2, %cst {dimension_numbers = #tpu.dot_dimension_numbers<[1], [0], [0], [1], [0, 0, 1, 1], [], []>} : vector<16x32xbf16>, vector<32x256xbf16>, vector<16x256xf32> -> vector<16x256xf32>
    %c0_3 = arith.constant 0 : index
    %c0_4 = arith.constant 0 : index
    %4 = vector.load %arg3[%c0_3, %c0_4] : memref<1x256xf32, #tpu.memory_space<vmem>>, vector<1x256xf32>
    %5 = vector.broadcast %4 : vector<1x256xf32> to vector<16x256xf32>
    %6 = arith.addf %3, %5 : vector<16x256xf32>
    %cst_5 = arith.constant 0.000000e+00 : f32
    %7 = vector.broadcast %cst_5 : f32 to vector<16x256xf32>
    %8 = arith.maximumf %6, %7 : vector<16x256xf32>
    %9 = arith.truncf %8 : vector<16x256xf32> to vector<16x256xbf16>
    %c0_6 = arith.constant 0 : index
    %c0_7 = arith.constant 0 : index
    %10 = vector.load %arg4[%c0_6, %c0_7] : memref<256x256xbf16, #tpu.memory_space<vmem>>, vector<256x256xbf16>
    %cst_8 = arith.constant dense<0.000000e+00> : vector<16x256xf32>
    %11 = tpu.matmul %9, %10, %cst_8 {dimension_numbers = #tpu.dot_dimension_numbers<[1], [0], [0], [1], [0, 0, 1, 1], [], []>} : vector<16x256xbf16>, vector<256x256xbf16>, vector<16x256xf32> -> vector<16x256xf32>
    %c0_9 = arith.constant 0 : index
    %c0_10 = arith.constant 0 : index
    %12 = vector.load %arg5[%c0_9, %c0_10] : memref<1x256xf32, #tpu.memory_space<vmem>>, vector<1x256xf32>
    %13 = vector.broadcast %12 : vector<1x256xf32> to vector<16x256xf32>
    %14 = arith.addf %11, %13 : vector<16x256xf32>
    %cst_11 = arith.constant 0.000000e+00 : f32
    %15 = vector.broadcast %cst_11 : f32 to vector<16x256xf32>
    %16 = arith.maximumf %14, %15 : vector<16x256xf32>
    %17 = arith.truncf %16 : vector<16x256xf32> to vector<16x256xbf16>
    %c0_12 = arith.constant 0 : index
    %c0_13 = arith.constant 0 : index
    %18 = vector.load %arg6[%c0_12, %c0_13] : memref<256x128xbf16, #tpu.memory_space<vmem>>, vector<256x128xbf16>
    %cst_14 = arith.constant dense<0.000000e+00> : vector<16x128xf32>
    %19 = tpu.matmul %17, %18, %cst_14 {dimension_numbers = #tpu.dot_dimension_numbers<[1], [0], [0], [1], [0, 0, 1, 1], [], []>} : vector<16x256xbf16>, vector<256x128xbf16>, vector<16x128xf32> -> vector<16x128xf32>
    %c0_15 = arith.constant 0 : index
    %c0_16 = arith.constant 0 : index
    %20 = vector.load %arg7[%c0_15, %c0_16] : memref<1x128xf32, #tpu.memory_space<vmem>>, vector<1x128xf32>
    %21 = vector.broadcast %20 : vector<1x128xf32> to vector<16x128xf32>
    %22 = arith.addf %19, %21 : vector<16x128xf32>
    %23 = math.tanh %22 : vector<16x128xf32>
    %cst_17 = arith.constant 1.000000e+00 : f32
    %24 = vector.broadcast %cst_17 : f32 to vector<16x128xf32>
    %25 = arith.mulf %24, %23 : vector<16x128xf32>
    %c0_18 = arith.constant 0 : index
    %c0_19 = arith.constant 0 : index
    %26 = vector.load %arg8[%c0_18, %c0_19] : memref<16x128xf32, #tpu.memory_space<vmem>>, vector<16x128xf32>
    tpu.vector_store %arg8[%c0_18, %c0_19], %25 {strides = array<i32>} : memref<16x128xf32, #tpu.memory_space<vmem>>, vector<16x128xf32>,
    return
  }
  func.func @transform_0(%arg0: i32) -> (i32, i32) {
    %c0_i32 = arith.constant 0 : i32
    %c0_i32_0 = arith.constant 0 : i32
    return %arg0, %c0_i32 : i32, i32
  }
  func.func @transform_1(%arg0: i32) -> (i32, i32) {
    %c0_i32 = arith.constant 0 : i32
    %c0_i32_0 = arith.constant 0 : i32
    %c0_i32_1 = arith.constant 0 : i32
    return %c0_i32, %c0_i32_0 : i32, i32
  }
  func.func @transform_2(%arg0: i32) -> (i32, i32) {
    %c0_i32 = arith.constant 0 : i32
    %c0_i32_0 = arith.constant 0 : i32
    %c0_i32_1 = arith.constant 0 : i32
    return %c0_i32, %c0_i32_0 : i32, i32
  }
  func.func @transform_3(%arg0: i32) -> (i32, i32) {
    %c0_i32 = arith.constant 0 : i32
    %c0_i32_0 = arith.constant 0 : i32
    %c0_i32_1 = arith.constant 0 : i32
    return %c0_i32, %c0_i32_0 : i32, i32
  }
  func.func @transform_4(%arg0: i32) -> (i32, i32) {
    %c0_i32 = arith.constant 0 : i32
    %c0_i32_0 = arith.constant 0 : i32
    %c0_i32_1 = arith.constant 0 : i32
    return %c0_i32, %c0_i32_0 : i32, i32
  }
  func.func @transform_5(%arg0: i32) -> (i32, i32) {
    %c0_i32 = arith.constant 0 : i32
    %c0_i32_0 = arith.constant 0 : i32
    %c0_i32_1 = arith.constant 0 : i32
    return %c0_i32, %c0_i32_0 : i32, i32
  }
  func.func @transform_6(%arg0: i32) -> (i32, i32) {
    %c0_i32 = arith.constant 0 : i32
    %c0_i32_0 = arith.constant 0 : i32
    %c0_i32_1 = arith.constant 0 : i32
    return %c0_i32, %c0_i32_0 : i32, i32
  }
  func.func @transform_7(%arg0: i32) -> (i32, i32) {
    %c0_i32 = arith.constant 0 : i32
    %c0_i32_0 = arith.constant 0 : i32
    return %arg0, %c0_i32 : i32, i32
  }
}

</mosaic_0001>

<bundles_post_ra>
// kernel: tpu_custom_call.1
= control target key start
LH: loop header
LB: loop body
LE: loop exit
PB: predicated region body
PF: predicated region fallthrough
CT: control target
= control target key end

     0   :  { %s1832_s0 = inlined_call_operand.hbm [shape: f32[32,32], index: 0, kind: input, shape index: {}]   ;;  %s1833_s1 = inlined_call_operand.hbm [shape: bf16[32,256], index: 1, kind: input, shape index: {}]   ;;  %s1834_s2 = inlined_call_operand.hbm [shape: f32[1,256], index: 2, kind: input, shape index: {}]   ;;  %s1835_s3 = inlined_call_operand.hbm [shape: bf16[256,256], index: 3, kind: input, shape index: {}]   ;;  %s1836_s4 = inlined_call_operand.vmem [shape: f32[1,256], index: 4, kind: input, shape index: {}]   ;;  %s1837_s5 = inlined_call_operand.hbm [shape: bf16[256,128], index: 5, kind: input, shape index: {}]   ;;  %s1838_s6 = inlined_call_operand.vmem [shape: f32[1,128], index: 6, kind: input, shape index: {}]   ;;  %s1839_s7 = inlined_call_operand.hbm [shape: f32[32,128], index: 7, kind: output, shape index: {}]  }
   0x1   :  { %1842 = sst [smem:[#allocation16_spill]] %s1833_s1 }
   0x2   :  { %12 = vsyncpa [#allocation3], 0 }
   0x3   :  { %14 = vsyncpa [#allocation3 + $0x1], 0 }
   0x4   :  { %15 = vsyncpa [#allocation6], 0 }
   0x5   :  { %16 = vsyncpa [#allocation9], 0 }
   0x6   :  { %17 = vsyncpa [#allocation4], 0 }
   0x7   :  { %19 = vsyncpa [#allocation4 + $0x1], 0  ;;  %s1648_s24 = smov 0   ;;  %s1650_s25 = smov 0  }
   0x8   :  { %s1652_s26 = smov 0   ;;  %s1654_s27 = smov 0  }
   0x9 LB: > { %s1669_s28 = sadd.s32 4294967295, %s1596_s27   ;;  %s988_s29 = sadd.s32 4294967294, %s1596_s27   ;;  %s1596_s27 = sphi %s1654_s27, %s1856_s27   ;;  %s1592_s26 = sphi %s1652_s26, %s1855_s26   ;;  %s1588_s25 = sphi %s1650_s25, %s1854_s25   ;;  %s1584_s24 = sphi %s1648_s24, %s1853_s24  }
   0xa   : > { %p45_p0 = scmp.ne.s32.totalorder %s1588_s25, %s1584_s24  ;;  %p46_p1 = scmp.eq.s32.totalorder %s1669_s28, 0 }
   0xb   : > { %p195_p2 = scmp.eq.s32.totalorder %s1669_s28, 1  ;;  %p201_p3 = scmp.eq.s32.totalorder %s988_s29, 1 }
   0xc   : > { %p1678_p4 = por %p46_p1, %p45_p0  ;;  %p989_p5 = scmp.ge.s32.totalorder %s1596_s27, 1 }
   0xd   : > { %p1683_p6 = por %p201_p3, %p45_p0  ;;  %p208_p7 = scmp.lt.s32.totalorder %s1596_s27, 3 }
   0xe   : > { %s1845_s1 = sld [smem:[#allocation16_spill]]  ;;  %s1598_s13 = smov [#allocation5]  }
   0xf   : > { %p1691_p8 = pnand %p989_p5, %p208_p7  ;;  %s221_s14 = sshll.u32 %s1598_s13, 4  ;;  %s222_s14 = int_to_ptr.vmem [resolvable:$true] %s221_s14 }
  0x10   : > { %s245_s18 = sshll.u32 %s1835_s3, 4  ;;  %s1840_s19 = smov 128   ;;  %s246_s18 = int_to_ptr.hbm [resolvable:$true] %s245_s18 }
  0x11   : > { %p1294_p9 = pneg %p1691_p8  ;;  %s1841_s20 = smov 8  }
  0x12   : > { %s1601_s21 = smov [#allocation8]   ;;  %s234_s9 = sshll.u32 %s1834_s2, 4  ;;  %s235_s9 = int_to_ptr.hbm [resolvable:$true] %s234_s9 }
  0x13   : > { %p1699_p10 = pnand %p1294_p9, %p46_p1  ;;  %s247_s22 = sshll.u32 %s1601_s21, 4  ;;  %s248_s22 = int_to_ptr.vmem [resolvable:$true] %s247_s22 }
  0x14   : > { %s219_s11 = sshll.u32 %s1845_s1, 4  ;;  %s1603_s17 = smov [#allocation10]   ;;  %s220_s11 = int_to_ptr.hbm [resolvable:$true] %s219_s11 }
  0x15   : > { %1297 = dma.hbm_to_vmem [thread:$0]  (!%p1699_p10), %s220_s11, 512, %s222_s14, [#allocation6], %s1840_s19, %s1840_s19, %s1841_s20  }
  0x16   : > { %1303 = dma.hbm_to_vmem [thread:$0]  (!%p1699_p10), %s246_s18, 4096, %s248_s22, [#allocation9], %s1840_s19, %s1840_s19, %s1841_s20  }
  0x17   : > { %s262_s11 = sshll.u32 %s1837_s5, 4  ;;  %s1602_s14 = smov [#allocation7]   ;;  %s263_s11 = int_to_ptr.hbm [resolvable:$true] %s262_s11 }
  0x18   : > { %s236_s16 = sshll.u32 %s1602_s14, 4  ;;  %s264_s18 = sshll.u32 %s1603_s17, 4  ;;  %s237_s16 = int_to_ptr.vmem [resolvable:$true] %s236_s16  ;;  %s265_s18 = int_to_ptr.vmem [resolvable:$true] %s264_s18 }
  0x19   : > { %1300 = dma.hbm_to_vmem [thread:$0]  (!%p1699_p10), %s235_s9, 32, %s237_s16, [#allocation6]  }
  0x1a   : > { %s1604_s21 = smov 64   ;;  %s1605_s22 = smov 4  }
  0x1b   : > { %1306 = dma.hbm_to_vmem [thread:$0]  (!%p1699_p10), %s263_s11, 2048, %s265_s18, [#allocation9], %s1604_s21, %s1604_s21, %s1605_s22  }
  0x1c   : > { %s1728_s23 = sadd.s32 1, %s1596_s27   ;;  %s32_s10 = sadd.s32 1, %s1592_s26 }
  0x1d   : > { %s29_s29 = ssub.s32 %s1596_s27, %s1728_s23  ;;  %p39_p13 = scmp.ne.s32.totalorder %s1592_s26, %s1588_s25 }
  0x1e   : > { %p30_p12 = scmp.eq.s32.totalorder %s29_s29, 0  ;;  %p40_p0 = scmp.eq.s32.totalorder %s1596_s27, 0 }
  0x1f   : > { %p1741_p5 = por %p195_p2, %p39_p13  ;;  %p1319_p7 = scmp.lt.s32.totalorder %s1596_s27, 2 }
  0x20   : > { %s1737_s13 = scalar_select %p30_p12, %s1592_s26, %s32_s10  }
  0x21   : > { %p41_p3 = por %p40_p0, %p39_p13  ;;  %s281_s14 = sand.u32 1, %s1592_s26  }
  0x22   : > { %s995_s15 = sshll.u32 %s281_s14, 4  ;;  %s1220_s11 = sshll.u32 %s1596_s27, 4 }
  0x23   : > { %s290_s18 = scalar_lea.hbm %s1832_s0, %s1220_s11  ;;  %s285_s21 = scalar_lea.vmem [#allocation2], %s995_s15 }
  0x24   : > { %s293_s22 = sshll.u32 %s285_s21, 4  ;;  %s291_s29 = sshll.u32 %s290_s18, 4  ;;  %s294_s22 = int_to_ptr.vmem [resolvable:$true] %s293_s22  ;;  %s292_s29 = int_to_ptr.hbm [resolvable:$true] %s291_s29 }
  0x25   : > { %p1751_p9 = pnand %p1319_p7, %p41_p3  ;;  %s282_s19 = scalar_lea.sflag [#allocation3], %s281_s14 }
  0x26   : > { %s1492_s20 = sshra.s32 %s292_s29, 4  ;;  %s1499_s16 = scalar_lea.hbm %s1832_s0, 32  ;;  %s1493_s20 = int_to_ptr.hbm [resolvable:$true] %s1492_s20 }
  0x27   : > { %s1494_s1 = scalar_lea.hbm %s1493_s20, 16  ;;  %p1496_p10 = pneg %p1751_p9 }
  0x28   : > { %p1495_p2 = scmp.ne.s32.totalorder %s1493_s20, %s1494_s1  ;;  %p1500_p0 = scmp.lt.s32.totalorder %s1493_s20, %s1832_s0 }
  0x29   : > { %p1501_p3 = scmp.lt.s32.totalorder %s1499_s16, %s1494_s1 }
  0x2a   : > { %p1497_p12 = pnand %p1496_p10, %p1495_p2 }
  0x2b   : > { %p1502_p7 = por %p1501_p3, %p1500_p0 }
  0x2c   : > { %p1498_p13 = pneg %p1497_p12 }
  0x2e   : > { %p1503_p11 = pnand %p1502_p7, %p1498_p13 }
  0x30   : > { %1506 = shalt.err (!%p1503_p11)
}
  0x31   : > { %s1850_s14 = smov 8   ;;  %s1851_s21 = smov 128  }
  0x32   : > { %1310 = dma.hbm_to_vmem [thread:$0]  (!%p1751_p9), %s292_s29, 256, %s294_s22, %s282_s19, %s1851_s21, %s1851_s21, %s1850_s14  }
  0x33   : > { %305 = sbr.rel (%p1691_p8) target bundleno = 515 (0x203), region = 48  ;;  %s1771_s11 = sand.u32 (!%p1691_p8), 1, %s1588_s25  }
  0x34   : > { %s999_s1 = sshll.u32 (!%p1691_p8), %s1771_s11, 4  ;;  %s308_s20 = scalar_lea.sflag (!%p1691_p8), [#allocation3], %s1771_s11 }
  0x35   : > { %s311_s15 = scalar_lea.vmem (!%p1691_p8), [#allocation2], %s999_s1 }
  0x38   : > { %1567 = dma.done.wait (%p1678_p4), %s308_s20, 256  }
  0x39   : > { %1569 = vsyncadd (%p1678_p4), %s308_s20, 4294967040 }
  0x3a   : > { %1571 = dma.done.wait (%p46_p1), [#allocation6], 544  }
  0x3b   : > { %1573 = vsyncadd (%p46_p1), [#allocation6], 4294966752 }
  0x3c   : > { %1575 = dma.done.wait (%p46_p1), [#allocation9], 6144  }
  0x3d   : > { %1577 = vsyncadd (%p46_p1), [#allocation9], 4294961152  ;;  %v1015_v0 = vld [vmem:[#allocation5 + $0x10] sm:$0xf]  ;;  %v1224_v1 = vld [vmem:[#allocation5 + $0x14] sm:$0xf0] }
  0x3e   : > { %v1223_v2 = vld [vmem:[#allocation5 + $0x14] sm:$0xf]  ;;  %v1016_v3 = vor.u32 %v1224_v1, %v1015_v0  ;;  %v1017_v4 = vld [vmem:[#allocation5 + $0x18] sm:$0xf0]  ;;  %v1007_v5 = vld [vmem:[#allocation5] sm:$0xf] }
  0x3f   : > { %v1222_v6 = vld [vmem:[#allocation5 + $0x4] sm:$0xf0]  ;;  %v1020_v7 = vor.u32 %v1223_v2, %v1017_v4  ;;  %v1221_v8 = vld [vmem:[#allocation5 + $0x4] sm:$0xf]  ;;  %v1009_v9 = vld [vmem:[#allocation5 + $0x8] sm:$0xf0] }
  0x40   : > { %v366_v10 = vld [vmem:[%s311_s15] sm:$0xff]  ;;  %409 = vmatpush.bf16.msra.mxu0 %v1016_v3  ;;  %v1008_v11 = vor.u32 %v1222_v6, %v1007_v5  ;;  %v367_v12 = vld [vmem:[%s311_s15 + $0x8] sm:$0xff]  ;;  %vm399_vm0 = vcmask 261120   ;;  %v1012_v15 = vor.u32 %v1221_v8, %v1009_v9  ;;  %s1273_s29 = sshll.u32 %s1669_s28, 4  ;;  %s362_s18 = scalar_lea.vmem [#allocation11], %s999_s1 }
  0x41   : > { %v1081_v13 = vld [vmem:[#allocation8 + $0x70] sm:$0xf]  ;;  %v1240_v14 = vld [vmem:[#allocation8 + $0x74] sm:$0xf0]  ;;  %423 = vmatpush.bf16.msra.mxu1 %v1020_v7  ;;  %v1239_v19 = vld [vmem:[#allocation8 + $0x74] sm:$0xf]  ;;  %v368_v24 = vpack.c.bf16 %v367_v12, %v366_v10  ;;  %s873_s17 = scalar_lea.hbm %s1839_s7, %s1273_s29 }
  0x42   : > { %v1082_v16 = vor.u32 %v1240_v14, %v1081_v13  ;;  %v1145_v17 = vld [vmem:[#allocation8 + $0xf0] sm:$0xf]  ;;  %v1256_v18 = vld [vmem:[#allocation8 + $0xf4] sm:$0xf0]  ;;  %v1083_v21 = vld [vmem:[#allocation8 + $0x78] sm:$0xf0] }
  0x43   : > { %v1146_v20 = vor.u32 %v1256_v18, %v1145_v17  ;;  %v1255_v22 = vld [vmem:[#allocation8 + $0xf4] sm:$0xf]  ;;  %v1147_v23 = vld [vmem:[#allocation8 + $0xf8] sm:$0xf0]  ;;  %v1086_v25 = vor.u32 %v1239_v19, %v1083_v21  ;;  %v1073_v27 = vld [vmem:[#allocation8 + $0x60] sm:$0xf] }
  0x44   : > { %635 = vmatpush.bf16.msra.mxu2 %v1082_v16  ;;  %v1150_v26 = vor.u32 %v1255_v22, %v1147_v23  ;;  %v1238_v28 = vld [vmem:[#allocation8 + $0x64] sm:$0xf0]  ;;  %v1137_v29 = vld [vmem:[#allocation8 + $0xe0] sm:$0xf]  ;;  %410 = vmatpush.bf16.msra.mxu0 %v1008_v11  ;;  %v1237_v32 = vld [vmem:[#allocation8 + $0x64] sm:$0xf] }
  0x45   : > { %649 = vmatpush.bf16.msra.mxu3 %v1146_v20  ;;  %v1074_v30 = vor.u32 %v1238_v28, %v1073_v27  ;;  %v1254_v31 = vld [vmem:[#allocation8 + $0xe4] sm:$0xf0]  ;;  %v1075_v33 = vld [vmem:[#allocation8 + $0x68] sm:$0xf0]  ;;  %424 = vmatpush.bf16.msra.mxu1 %v1012_v15  ;;  %v1253_v36 = vld [vmem:[#allocation8 + $0xe4] sm:$0xf] }
  0x46   : > { %v1138_v34 = vor.u32 %v1254_v31, %v1137_v29  ;;  %v1078_v35 = vor.u32 %v1237_v32, %v1075_v33  ;;  %v1139_v37 = vld [vmem:[#allocation8 + $0xe8] sm:$0xf0]  ;;  %v1065_v38 = vld [vmem:[#allocation8 + $0x50] sm:$0xf]  ;;  %v1236_v40 = vld [vmem:[#allocation8 + $0x54] sm:$0xf0] }
  0x47   : > { %v1142_v39 = vor.u32 %v1253_v36, %v1139_v37  ;;  %v1129_v41 = vld [vmem:[#allocation8 + $0xd0] sm:$0xf]  ;;  %v1252_v42 = vld [vmem:[#allocation8 + $0xd4] sm:$0xf0]  ;;  %1021 = vmatmul.msk.bf16.vlgmr.msra.gmra.mxu0 %vm399_vm0, %v368_v24  ;;  %v1066_v43 = vor.u32 %v1236_v40, %v1065_v38  ;;  %v1235_v44 = vld [vmem:[#allocation8 + $0x54] sm:$0xf] }
  0x48   : > { %663 = vmatpush.bf16.msrb.mxu0 %v1086_v25  ;;  %636 = vmatpush.bf16.msra.mxu2 %v1074_v30  ;;  %v1067_v45 = vld [vmem:[#allocation8 + $0x58] sm:$0xf0]  ;;  %v1251_v46 = vld [vmem:[#allocation8 + $0xd4] sm:$0xf]  ;;  %v1130_v47 = vor.u32 %v1252_v42, %v1129_v41  ;;  %v1057_v49 = vld [vmem:[#allocation8 + $0x40] sm:$0xf] }
  0x49   : > { %677 = vmatpush.bf16.msrb.mxu1 %v1150_v26  ;;  %650 = vmatpush.bf16.msra.mxu3 %v1138_v34  ;;  %v1131_v48 = vld [vmem:[#allocation8 + $0xd8] sm:$0xf0]  ;;  %v1234_v50 = vld [vmem:[#allocation8 + $0x44] sm:$0xf0]  ;;  %v1070_v51 = vor.u32 %v1235_v44, %v1067_v45  ;;  %v1121_v52 = vld [vmem:[#allocation8 + $0xc0] sm:$0xf] }
  0x4a   : > { %1022 = vmatmul.msk.bf16.vlgmr.msra.gmra.mxu1 %vm399_vm0, %v368_v24  ;;  %v1250_v53 = vld [vmem:[#allocation8 + $0xc4] sm:$0xf0]  ;;  %v1134_v54 = vor.u32 %v1251_v46, %v1131_v48  ;;  %v1233_v55 = vld [vmem:[#allocation8 + $0x44] sm:$0xf]  ;;  %v1059_v56 = vld [vmem:[#allocation8 + $0x48] sm:$0xf0]  ;;  %v1058_v57 = vor.u32 %v1234_v50, %v1057_v49 }
  0x4b   : > { %v1249_v58 = vld [vmem:[#allocation8 + $0xc4] sm:$0xf]  ;;  %v1123_v59 = vld [vmem:[#allocation8 + $0xc8] sm:$0xf0]  ;;  %v1122_v60 = vor.u32 %v1250_v53, %v1121_v52  ;;  %v1062_v61 = vor.u32 %v1233_v55, %v1059_v56  ;;  %v1049_v63 = vld [vmem:[#allocation8 + $0x30] sm:$0xf] }
  0x4c   : > { %664 = vmatpush.bf16.msrb.mxu0 %v1078_v35  ;;  %637 = vmatpush.bf16.msra.mxu2 %v1066_v43  ;;  %v1126_v62 = vor.u32 %v1249_v58, %v1123_v59  ;;  %v1232_v0 = vld [vmem:[#allocation8 + $0x34] sm:$0xf0]  ;;  %v1113_v1 = vld [vmem:[#allocation8 + $0xb0] sm:$0xf]  ;;  %v1231_v4 = vld [vmem:[#allocation8 + $0x34] sm:$0xf] }
  0x4d   : > { %678 = vmatpush.bf16.msrb.mxu1 %v1142_v39  ;;  %651 = vmatpush.bf16.msra.mxu3 %v1130_v47  ;;  %v1050_v2 = vor.u32 %v1232_v0, %v1049_v63  ;;  %v1248_v3 = vld [vmem:[#allocation8 + $0xb4] sm:$0xf0]  ;;  %v1051_v5 = vld [vmem:[#allocation8 + $0x38] sm:$0xf0]  ;;  %v1247_v8 = vld [vmem:[#allocation8 + $0xb4] sm:$0xf] }
  0x4e   : > { %v1114_v6 = vor.u32 %v1248_v3, %v1113_v1  ;;  %v1054_v7 = vor.u32 %v1231_v4, %v1051_v5  ;;  %v1115_v9 = vld [vmem:[#allocation8 + $0xb8] sm:$0xf0]  ;;  %v1041_v11 = vld [vmem:[#allocation8 + $0x20] sm:$0xf]  ;;  %v1230_v12 = vld [vmem:[#allocation8 + $0x24] sm:$0xf0] }
  0x4f   : > { %v1118_v10 = vor.u32 %v1247_v8, %v1115_v9  ;;  %v1042_v13 = vor.u32 %v1230_v12, %v1041_v11  ;;  %v1105_v14 = vld [vmem:[#allocation8 + $0xa0] sm:$0xf]  ;;  %v1246_v15 = vld [vmem:[#allocation8 + $0xa4] sm:$0xf0]  ;;  %v1229_v16 = vld [vmem:[#allocation8 + $0x24] sm:$0xf] }
  0x50   : > { %665 = vmatpush.bf16.msrb.mxu0 %v1070_v51  ;;  %638 = vmatpush.bf16.msra.mxu2 %v1058_v57  ;;  %v1106_v17 = vor.u32 %v1246_v15, %v1105_v14  ;;  %v1043_v18 = vld [vmem:[#allocation8 + $0x28] sm:$0xf0]  ;;  %v1245_v19 = vld [vmem:[#allocation8 + $0xa4] sm:$0xf]  ;;  %v1033_v23 = vld [vmem:[#allocation8 + $0x10] sm:$0xf] }
  0x51   : > { %679 = vmatpush.bf16.msrb.mxu1 %v1134_v54  ;;  %652 = vmatpush.bf16.msra.mxu3 %v1122_v60  ;;  %v1107_v20 = vld [vmem:[#allocation8 + $0xa8] sm:$0xf0]  ;;  %v1046_v21 = vor.u32 %v1229_v16, %v1043_v18  ;;  %v1228_v24 = vld [vmem:[#allocation8 + $0x14] sm:$0xf0]  ;;  %v1097_v25 = vld [vmem:[#allocation8 + $0x90] sm:$0xf] }
  0x52   : > { %v1110_v22 = vor.u32 %v1245_v19, %v1107_v20  ;;  %v1034_v26 = vor.u32 %v1228_v24, %v1033_v23  ;;  %v1244_v27 = vld [vmem:[#allocation8 + $0x94] sm:$0xf0]  ;;  %v1227_v28 = vld [vmem:[#allocation8 + $0x14] sm:$0xf]  ;;  %v1035_v29 = vld [vmem:[#allocation8 + $0x18] sm:$0xf0] }
  0x53   : > { %v1098_v30 = vor.u32 %v1244_v27, %v1097_v25  ;;  %v1038_v31 = vor.u32 %v1227_v28, %v1035_v29  ;;  %v1243_v32 = vld [vmem:[#allocation8 + $0x94] sm:$0xf]  ;;  %v1099_v33 = vld [vmem:[#allocation8 + $0x98] sm:$0xf0]  ;;  %v1025_v35 = vld [vmem:[#allocation8] sm:$0xf] }
  0x54   : > { %666 = vmatpush.bf16.msrb.mxu0 %v1062_v61  ;;  %639 = vmatpush.bf16.msra.mxu2 %v1050_v2  ;;  %v1102_v34 = vor.u32 %v1243_v32, %v1099_v33  ;;  %v1226_v36 = vld [vmem:[#allocation8 + $0x4] sm:$0xf0]  ;;  %v1089_v37 = vld [vmem:[#allocation8 + $0x80] sm:$0xf]  ;;  %v1225_v40 = vld [vmem:[#allocation8 + $0x4] sm:$0xf] }
  0x55   : > { %680 = vmatpush.bf16.msrb.mxu1 %v1126_v62  ;;  %653 = vmatpush.bf16.msra.mxu3 %v1114_v6  ;;  %v1026_v38 = vor.u32 %v1226_v36, %v1025_v35  ;;  %v1242_v39 = vld [vmem:[#allocation8 + $0x84] sm:$0xf0]  ;;  %v1027_v41 = vld [vmem:[#allocation8 + $0x8] sm:$0xf0]  ;;  %v1241_v44 = vld [vmem:[#allocation8 + $0x84] sm:$0xf] }
  0x56   : > { %v1090_v42 = vor.u32 %v1242_v39, %v1089_v37  ;;  %v1030_v43 = vor.u32 %v1225_v40, %v1027_v41  ;;  %v1091_v45 = vld [vmem:[#allocation8 + $0x88] sm:$0xf0]  ;;  %v1272_v47 = vld [vmem:[#allocation10 + $0x78] sm:$0xff]  ;;  %v1271_v49 = vld [vmem:[#allocation10 + $0x70] sm:$0xff]  ;;  %s874_s14 = sshll.u32 %s362_s18, 4  ;;  %s876_s21 = sshll.u32 %s873_s17, 4  ;;  %s875_s14 = int_to_ptr.vmem [resolvable:$true] %s874_s14  ;;  %s877_s21 = int_to_ptr.hbm [resolvable:$true] %s876_s21 }
  0x57   : > { %v1094_v46 = vor.u32 %v1241_v44, %v1091_v45  ;;  %v1264_v48 = vld [vmem:[#allocation10 + $0x38] sm:$0xff]  ;;  %v1263_v50 = vld [vmem:[#allocation10 + $0x30] sm:$0xff]  ;;  %v1270_v51 = vld [vmem:[#allocation10 + $0x68] sm:$0xff]  ;;  %s862_s28 = scalar_lea.sflag [#allocation4], %s1771_s11  ;;  %s1536_s20 = sshra.s32 %s877_s21, 4  ;;  %s1537_s20 = int_to_ptr.hbm [resolvable:$true] %s1536_s20 }
  0x58   : > { %667 = vmatpush.bf16.msrb.mxu0 %v1054_v7  ;;  %640 = vmatpush.bf16.msra.mxu2 %v1042_v13  ;;  %v1269_v52 = vld [vmem:[#allocation10 + $0x60] sm:$0xff]  ;;  %v373_v53 = vld [vmem:[#allocation7] sm:$0x3]  ;;  %v1262_v6 = vld [vmem:[#allocation10 + $0x28] sm:$0xff]  ;;  %s1538_s15 = scalar_lea.hbm %s1537_s20, 16  ;;  %s1542_s1 = scalar_lea.hbm %s1839_s7, 32 }
  0x59   : > { %681 = vmatpush.bf16.msrb.mxu1 %v1118_v10  ;;  %654 = vmatpush.bf16.msra.mxu3 %v1106_v17  ;;  %v375_v56 = vperm.slane %v373_v53, 0  ;;  %v376_v57 = vperm.slane %v373_v53, 1  ;;  %v1268_v7 = vld [vmem:[#allocation10 + $0x58] sm:$0xff]  ;;  %v1261_v8 = vld [vmem:[#allocation10 + $0x20] sm:$0xff]  ;;  %v1267_v9 = vld [vmem:[#allocation10 + $0x50] sm:$0xff]  ;;  %p1539_p1 = scmp.ne.s32.totalorder %s1537_s20, %s1538_s15  ;;  %p1543_p11 = scmp.lt.s32.totalorder %s1537_s20, %s1839_s7 }
  0x5a   : > { %v1260_v10 = vld [vmem:[#allocation10 + $0x18] sm:$0xff]  ;;  %v1266_v11 = vld [vmem:[#allocation10 + $0x48] sm:$0xff]  ;;  %v1259_v12 = vld [vmem:[#allocation10 + $0x10] sm:$0xff]  ;;  %p1544_p9 = scmp.lt.s32.totalorder %s1542_s1, %s1538_s15 }
  0x5b   : > { %v1265_v13 = vld [vmem:[#allocation10 + $0x40] sm:$0xff]  ;;  %v1258_v14 = vld [vmem:[#allocation10 + $0x8] sm:$0xff]  ;;  %v469_v16 = vld [vmem:[%s1836_s4] sm:$0x3]  ;;  %p1540_p4 = pnand %p1539_p1, %p1741_p5 }
  0x5c   : > { %668 = vmatpush.bf16.msrb.mxu0 %v1046_v21  ;;  %641 = vmatpush.bf16.msra.mxu2 %v1034_v26  ;;  %v1257_v15 = vld [vmem:[#allocation10] sm:$0xff]  ;;  %v472_v18 = vperm.slane %v469_v16, 1  ;;  %v1367_v41 = vld [vmem:[%s1838_s6] ss:$0 sm:$0xff]  ;;  %p1545_p2 = por %p1544_p9, %p1543_p11 }
  0x5d   : > { %682 = vmatpush.bf16.msrb.mxu1 %v1110_v22  ;;  %655 = vmatpush.bf16.msra.mxu3 %v1098_v30  ;;  %v471_v22 = vperm.slane %v469_v16, 0  ;;  %p1541_p8 = pneg %p1540_p4 }
  0x5f   : > { %p1546_p10 = pnand %p1545_p2, %p1541_p8 }
  0x60   : > { %669 = vmatpush.bf16.msrb.mxu0 %v1038_v31  ;;  %642 = vmatpush.bf16.msra.mxu2 %v1026_v38 }
  0x61   : > { %683 = vmatpush.bf16.msrb.mxu1 %v1102_v34  ;;  %656 = vmatpush.bf16.msra.mxu3 %v1090_v42 }
  0x64   : > { %670 = vmatpush.bf16.msrb.mxu0 %v1030_v43  ;;  %829 = vmatpush.bf16.msrb.mxu2 %v1264_v48 }
  0x65   : > { %684 = vmatpush.bf16.msrb.mxu1 %v1094_v46  ;;  %843 = vmatpush.bf16.msrb.mxu3 %v1272_v47 }
  0x68   : > { %830 = vmatpush.bf16.msrb.mxu2 %v1263_v50 }
  0x69   : > { %844 = vmatpush.bf16.msrb.mxu3 %v1271_v49 }
  0x6c   : > { %831 = vmatpush.bf16.msrb.mxu2 %v1262_v6 }
  0x6d   : > { %845 = vmatpush.bf16.msrb.mxu3 %v1270_v51 }
  0x70   : > { %832 = vmatpush.bf16.msrb.mxu2 %v1261_v8 }
  0x71   : > { %846 = vmatpush.bf16.msrb.mxu3 %v1269_v52 }
  0x74   : > { %833 = vmatpush.bf16.msrb.mxu2 %v1260_v10 }
  0x75   : > { %847 = vmatpush.bf16.msrb.mxu3 %v1268_v7 }
  0x78   : > { %834 = vmatpush.bf16.msrb.mxu2 %v1259_v12 }
  0x79   : > { %848 = vmatpush.bf16.msrb.mxu3 %v1267_v9 }
  0x7c   : > { %835 = vmatpush.bf16.msrb.mxu2 %v1258_v14 }
  0x7d   : > { %849 = vmatpush.bf16.msrb.mxu3 %v1266_v11 }
  0x80   : > { %836 = vmatpush.bf16.msrb.mxu2 %v1257_v15 }
  0x81   : > { %850 = vmatpush.bf16.msrb.mxu3 %v1265_v13 }
  0xc4   : > { %v412_v54 = vpop.f32.mrf.mxu0 }
  0xc5   : > { %v413_v58 = vadd.f32 %v412_v54, %v375_v56 }
  0xc7   : > { %v426_v55 = vpop.f32.mrf.mxu1  ;;  %v431_v0 = vmax.f32 %v413_v58, 0.0 }
  0xc8   : > { %v427_v59 = vadd.f32 %v426_v55, %v376_v57 }
  0xca   : > { %v432_v2 = vmax.f32 %v427_v59, 0.0 }
  0xcc   : > { %v414_v60 = vpop.f32.mrf.mxu0 }
  0xcd   : > { %v415_v61 = vadd.f32 %v414_v60, %v375_v56 }
  0xcf   : > { %v428_v62 = vpop.f32.mrf.mxu1  ;;  %v433_v1 = vmax.f32 %v415_v61, 0.0 }
  0xd0   : > { %v429_v63 = vadd.f32 %v428_v62, %v376_v57 }
  0xd1   : > { %v435_v4 = vpack.c.bf16 %v433_v1, %v431_v0 }
  0xd2   : > { %v434_v3 = vmax.f32 %v429_v63, 0.0 }
  0xd3   : > { %643 = vmatmul.bf16.vlgmr.msra.gmra.mxu2 %v435_v4  ;;  %671 = vmatmul.bf16.vlgmr.msrb.gmra.mxu0 %v435_v4 }
  0xd4   : > { %v436_v5 = vpack.c.bf16 %v434_v3, %v432_v2 }
  0xd6   : > { %657 = vmatmul.bf16.vlgmr.msra.gmra.mxu3 %v436_v5  ;;  %685 = vmatmul.bf16.vlgmr.msrb.gmra.mxu1 %v436_v5 }
 0x150   : > { %v672_v17 = vpop.f32.mrf.mxu0 }
 0x151   : > { %v673_v20 = vadd.f32 %v672_v17, %v472_v18 }
 0x153   : > { %v686_v19 = vpop.f32.mrf.mxu1 }
 0x154   : > { %v687_v25 = vadd.f32 %v686_v19, %v673_v20 }
 0x156   : > { %v644_v21 = vpop.f32.mrf.mxu2  ;;  %v692_v30 = vmax.f32 %v687_v25, 0.0 }
 0x157   : > { %v645_v28 = vadd.f32 %v644_v21, %v471_v22 }
 0x158   : > { %v674_v24 = vpop.f32.mrf.mxu0 }
 0x159   : > { %v658_v23 = vpop.f32.mrf.mxu3  ;;  %v675_v26 = vadd.f32 %v674_v24, %v472_v18 }
 0x15a   : > { %v659_v33 = vadd.f32 %v658_v23, %v645_v28 }
 0x15b   : > { %v688_v27 = vpop.f32.mrf.mxu1 }
 0x15c   : > { %v689_v29 = vadd.f32 %v688_v27, %v675_v26  ;;  %v691_v38 = vmax.f32 %v659_v33, 0.0 }
 0x15e   : > { %v694_v31 = vmax.f32 %v689_v29, 0.0  ;;  %v646_v32 = vpop.f32.mrf.mxu2 }
 0x15f   : > { %v647_v35 = vadd.f32 %v646_v32, %v471_v22 }
 0x160   : > { %v696_v34 = vpack.c.bf16 %v694_v31, %v692_v30 }
 0x161   : > { %v660_v36 = vpop.f32.mrf.mxu3 }
 0x162   : > { %v661_v37 = vadd.f32 %v660_v36, %v647_v35  ;;  %851 = vmatmul.bf16.vlgmr.msrb.gmra.mxu3 %v696_v34 }
 0x164   : > { %v693_v39 = vmax.f32 %v661_v37, 0.0 }
 0x166   : > { %v695_v40 = vpack.c.bf16 %v693_v39, %v691_v38 }
 0x168   : > { %837 = vmatmul.bf16.vlgmr.msrb.gmra.mxu2 %v695_v40 }
 0x1e5   : > { %v852_v42 = vpop.f32.mrf.mxu3 }
 0x1eb   : > { %v838_v43 = vpop.f32.mrf.mxu2 }
 0x1ec   : > { %v839_v44 = vadd.f32 %v1367_v41, %v838_v43 }
 0x1ed   : > { %v854_v48 = vpop.f32.mrf.mxu3 }
 0x1ee   : > { %v853_v45 = vadd.f32 %v852_v42, %v839_v44 }
 0x1f0   : > { %1368 = vtanh.f32 %v853_v45 }
 0x1f3   : > { %v840_v46 = vpop.f32.mrf.mxu2 }
 0x1f4   : > { %v841_v47 = vadd.f32 %v1367_v41, %v840_v46 }
 0x1f6   : > { %v1369_v49 = vpop.eup %1368  ;;  %v855_v50 = vadd.f32 %v854_v48, %v841_v47 }
 0x1f7   : > { %859 = vst [vmem:[%s362_s18] sm:$0xff] %v1369_v49 }
 0x1f8   : > { %1370 = vtanh.f32 %v855_v50 }
 0x1fe   : > { %v1371_v51 = vpop.eup %1370 }
 0x1ff   : > { %860 = vst [vmem:[%s362_s18 + $0x8] sm:$0xff] %v1371_v51 }
 0x200   : > { %1549 = shalt.err (!%p1546_p10)
}
 0x201   : > { %s1606_s11 = smov 128   ;;  %s1607_s29 = smov 8  }
 0x202   : > { %1292 = dma.vmem_to_hbm [thread:$0]  (%p1741_p5), %s875_s14, 256, %s877_s21, %s862_s28, %s1606_s11, %s1606_s11, %s1607_s29  }
 0x203 PF: > { %s891_s10 = sand.u32 1, %s1584_s24   ;;  %p1852_p12 = scmp.ge.s32.totalorder %s1596_s27, 2 }
 0x204   : > { %s892_s16 = scalar_lea.sflag [#allocation4], %s891_s10 }
 0x205   : > { %p1312_p13 = pnand %p1852_p12, %p1683_p6 }
 0x207   : > { %p1313_p0 = pneg %p1312_p13 }
 0x209   : > { %1579 = dma.done.wait (%p1313_p0), %s892_s16, 256  }
 0x20a   : > { %1581 = vsyncadd (%p1313_p0), %s892_s16, 4294967040  ;;  %p22_p3 = scmp.ge.s32.totalorder %s1728_s23, 4   ;;  %s1853_s24 = smov %s1588_s25 }
 0x20b   : > { %s1854_s25 = smov %s1592_s26  ;;  %s1855_s26 = smov %s1737_s13 }
 0x20c   : > { %s1856_s27 = smov %s1728_s23  ;;  %24 = sbr.rel (!%p22_p3) target bundleno = 9 (0x9), region = 109 }
 0x211   :  { %898 = vsyncpa [#allocation3], 1 }
 0x212   :  { %900 = vsyncpa [#allocation3 + $0x1], 1 }
 0x213   :  { %901 = vsyncpa [#allocation6], 1 }
 0x214   :  { %902 = vsyncpa [#allocation9], 1 }
 0x215   :  { %903 = vsyncpa [#allocation4], 1 }
 0x216   :  { %905 = vsyncpa [#allocation4 + $0x1], 1 }

</bundles_post_ra>
